<compile_context>
chip_gen: v7x
topology: tpu7x:2x2x1
jax: 0.10.0
libtpu: 0.0.40
codegen_flags: <defaults>
</compile_context>

<pallas_src>
import math

import jax
import jax.numpy as jnp
from jax import lax
from jax.experimental import pallas as pl
from jax.experimental.pallas import tpu as pltpu


_INV_SQRT2 = 0.7071067811865476
_VMEM_LIMIT = 16 * 1024 * 1024     # per-step working set <= ~6 MiB; << v7x 64 MiB
_PALLAS_MIN_BATCH = 512            # below this, plain-jnp fallback (launch overhead)
_MAX_TILE = 2048                   # ~85%+ of HBM roofline reached by tile >= 512


# ----------------------------------------------------------------------------
# Pallas kernels (output heads)
# ----------------------------------------------------------------------------
def _two_class_from_diff(d, o_ref):
    """2-class softmax from the logit difference d = l0 - l1.

    p0 = sigmoid(d), p1 = 1 - p0 (rows sum to 1 exactly).  Clamp keeps the
    exp intermediate finite; reciprocal goes to the EUP (approx)."""
    d = jnp.clip(d, -60.0, 60.0)
    p0 = pl.reciprocal(1.0 + jnp.exp(-d), approx=True)       # (TB, 1)
    col = lax.broadcasted_iota(jnp.int32, o_ref.shape, 1)     # (TB, 2)
    o_ref[...] = jnp.where(col == 0, p0, 1.0 - p0).astype(o_ref.dtype)


def _flat_head_kernel(cp_ref, seq_ref, wd_cp_ref, wd_seq_ref, bd_ref, o_ref):
    # FlattenedOutput.final_layer: Linear(F -> 2) + Softmax(dim=1), rewritten
    # as the single logit difference d = x . (w0 - w1) + (b0 - b1), accumulated
    # over the two concat segments (cls+phenos | seq).  N=2 never touches the
    # MXU: VPU multiplies + one XLU lane reduction per segment.
    x_cp = cp_ref[...].astype(jnp.float32)
    x_sq = seq_ref[...].astype(jnp.float32)
    wd_cp = wd_cp_ref[...].astype(jnp.float32)     # (1, F_cp) sublane-broadcast
    wd_sq = wd_seq_ref[...].astype(jnp.float32)    # (1, F_seq)
    d = jnp.sum(x_cp * wd_cp, axis=1, keepdims=True)
    d = d + jnp.sum(x_sq * wd_sq, axis=1, keepdims=True)
    d = d + bd_ref[0]                              # bias difference from SMEM
    _two_class_from_diff(d, o_ref)


def _tok_head_kernel(x_ref, wT_ref, b_ref, o_ref):
    # TokenOutput.final_layer: Linear(E -> 2) + GELU(exact erf) + Softmax(dim=1).
    # GELU is applied per-logit, so both logits are needed before the
    # 2-class-difference sigmoid.
    x = x_ref[...].astype(jnp.float32)
    w0 = wT_ref[0:1, :].astype(jnp.float32)        # (1, E)
    w1 = wT_ref[1:2, :].astype(jnp.float32)
    l0 = jnp.sum(x * w0, axis=1, keepdims=True) + b_ref[0]
    l1 = jnp.sum(x * w1, axis=1, keepdims=True) + b_ref[1]
    # exact-erf GELU to match PyTorch nn.GELU default
    g0 = 0.5 * l0 * (1.0 + lax.erf(l0 * _INV_SQRT2))
    g1 = 0.5 * l1 * (1.0 + lax.erf(l1 * _INV_SQRT2))
    _two_class_from_diff(g0 - g1, o_ref)


# ----------------------------------------------------------------------------
# pallas_call wrappers
# ----------------------------------------------------------------------------
def _batch_tile(B):
    # Small B: a single full-extent block (always legal w.r.t. the (8,128) rule).
    if B <= 256:
        return B
    # Large B: biggest tile (amortize ~0.35us/grid step) that still leaves
    # >= 2 grid steps so the "parallel" batch axis can shard across both v7x
    # TensorCores (no-op on v5e/v6e single-TC); multiple of 8 for sublane tiling.
    tb = min(_MAX_TILE, (B + 1) // 2)
    return max(8, (tb // 8) * 8)


def _flat_head(cp2, seq2, wd_cp, wd_seq, bdiff, *, force_pallas=False):
    """cp2:(B, E*(1+P)), seq2:(B, S*E), wd_*:(1, Fseg), bdiff:(1,) -> probs:(B, 2)."""
    B = cp2.shape[0]
    if B < _PALLAS_MIN_BATCH and not force_pallas:
        # Small-batch fallback: pallas launch/DMA setup dominates; let XLA fuse.
        d = (jnp.matmul(cp2.astype(jnp.float32), wd_cp[0],
                        precision=lax.Precision.HIGHEST)
             + jnp.matmul(seq2.astype(jnp.float32), wd_seq[0],
                          precision=lax.Precision.HIGHEST)
             + bdiff[0])
        p0 = jax.nn.sigmoid(d)
        return jnp.stack([p0, 1.0 - p0], axis=1)

    TB = _batch_tile(B)
    f_cp, f_seq = cp2.shape[1], seq2.shape[1]
    return pl.pallas_call(
        _flat_head_kernel,
        out_shape=jax.ShapeDtypeStruct((B, 2), jnp.float32),
        grid=(pl.cdiv(B, TB),),
        in_specs=[
            pl.BlockSpec((TB, f_cp), lambda i: (i, 0)),
            pl.BlockSpec((TB, f_seq), lambda i: (i, 0)),
            pl.BlockSpec((1, f_cp), lambda i: (0, 0)),            # weights resident
            pl.BlockSpec((1, f_seq), lambda i: (0, 0)),
            pl.BlockSpec(memory_space=pltpu.MemorySpace.SMEM),    # bias-diff scalar
        ],
        out_specs=pl.BlockSpec((TB, 2), lambda i: (i, 0)),
        compiler_params=pltpu.CompilerParams(
            dimension_semantics=("parallel",),
            vmem_limit_bytes=_VMEM_LIMIT),
    )(cp2, seq2, wd_cp, wd_seq, bdiff)


def _tok_head(cls2, wT, b, *, force_pallas=False):
    """cls2:(B, E), wT:(2, E), b:(2,) -> probs:(B, 2)."""
    B, E = cls2.shape
    if B < _PALLAS_MIN_BATCH and not force_pallas:
        logits = jnp.matmul(cls2.astype(jnp.float32), wT.T,
                            precision=lax.Precision.HIGHEST) + b
        g = 0.5 * logits * (1.0 + lax.erf(logits * _INV_SQRT2))
        return jax.nn.softmax(g, axis=1)

    TB = _batch_tile(B)
    return pl.pallas_call(
        _tok_head_kernel,
        out_shape=jax.ShapeDtypeStruct((B, 2), jnp.float32),
        grid=(pl.cdiv(B, TB),),
        in_specs=[
            pl.BlockSpec((TB, E), lambda i: (i, 0)),
            pl.BlockSpec((2, E), lambda i: (0, 0)),
            pl.BlockSpec(memory_space=pltpu.MemorySpace.SMEM),
        ],
        out_specs=pl.BlockSpec((TB, 2), lambda i: (i, 0)),
        compiler_params=pltpu.CompilerParams(
            dimension_semantics=("parallel",),
            vmem_limit_bytes=_VMEM_LIMIT),
    )(cls2, wT, b)


# ----------------------------------------------------------------------------
# Output-head modules (PyTorch-style uniform(-1/sqrt(fan_in), 1/sqrt(fan_in)))
# ----------------------------------------------------------------------------
class FlattenedOutput:
    def __init__(self, key, embed_dim, seq_len, num_phenos, force_pallas=False):
        # seq_len == params['encoder_size'] (counts the cls token), matching
        # nn.Linear(embed_dim * (seq_len + num_phenos), 2).
        self.embed_dim = embed_dim
        self.num_phenos = num_phenos
        self.force_pallas = force_pallas
        in_f = embed_dim * (seq_len + num_phenos)
        k1, k2 = jax.random.split(key)
        bound = 1.0 / math.sqrt(in_f)
        self.w = jax.random.uniform(k1, (in_f, 2), jnp.float32, -bound, bound)
        self.b = jax.random.uniform(k2, (2,), jnp.float32, -bound, bound)
        # Only the logit DIFFERENCE enters the 2-class softmax: precompute
        # wdiff = w[:,0]-w[:,1] split by concat segment (cls+phenos | seq) and
        # bdiff = b0-b1.  Halves weight traffic and in-kernel reductions.
        f_cp = embed_dim * (1 + num_phenos)
        wdiff = self.w[:, 0] - self.w[:, 1]
        self.wd_cp = jnp.asarray(wdiff[:f_cp].reshape(1, f_cp))
        self.wd_seq = jnp.asarray(wdiff[f_cp:].reshape(1, -1))
        self.bdiff = jnp.asarray((self.b[0] - self.b[1]).reshape(1))

    def __call__(self, enc_out):
        cls_tok, phenos, seq_out = enc_out
        B = cls_tok.shape[0]
        # cls + phenos merged into one contiguous segment (tiny (B, E*(1+P))
        # copy); the large seq segment is a free row-major reshape — no HBM
        # concat of the full flattened vector.
        cp2 = jnp.concatenate([cls_tok.reshape(B, -1), phenos.reshape(B, -1)],
                              axis=1)
        seq2 = seq_out.reshape(B, -1)
        assert cp2.shape[1] == self.wd_cp.shape[1]
        assert seq2.shape[1] == self.wd_seq.shape[1], (
            "seq_out must carry exactly encoder_size - 1 tokens (cls excluded)")
        return _flat_head(cp2, seq2, self.wd_cp, self.wd_seq, self.bdiff,
                          force_pallas=self.force_pallas)


class TokenOutput:
    def __init__(self, key, embed_dim, force_pallas=False):
        self.force_pallas = force_pallas
        k1, k2 = jax.random.split(key)
        bound = 1.0 / math.sqrt(embed_dim)
        self.w = jax.random.uniform(k1, (embed_dim, 2), jnp.float32, -bound, bound)
        self.b = jax.random.uniform(k2, (2,), jnp.float32, -bound, bound)
        self.wT = jnp.asarray(self.w.T)          # (2, E)

    def __call__(self, enc_out):
        cls_tok, phenos, seq_out = enc_out
        self.last_input = cls_tok
        cls2 = cls_tok.reshape(cls_tok.shape[0], -1)   # (B, E)
        return _tok_head(cls2, self.wT, self.b, force_pallas=self.force_pallas)


# ----------------------------------------------------------------------------
# Encoder stub + TransformerModel
# ----------------------------------------------------------------------------
class SyntheticEncoder:
    # TODO(synk): the real encoder (Linformer-style blocks) is an external
    # dependency not provided with the module; this deterministic embedding
    # stub only supplies enc_out = (cls_tok, phenos_emb, seq_out) with the
    # shapes TransformerModel's output heads expect.
    def __init__(self, key, embed_dim, num_phenos, seq_len):
        self.embed_dim = embed_dim
        self.num_phenos = num_phenos
        self.seq_len = seq_len
        k1, k2, k3 = jax.random.split(key, 3)
        self.cls = 0.02 * jax.random.normal(k1, (1, 1, embed_dim), jnp.float32)
        self.w_pheno = 0.02 * jax.random.normal(k2, (embed_dim,), jnp.float32)
        self.w_geno = 0.02 * jax.random.normal(k3, (embed_dim,), jnp.float32)

    def __call__(self, phenos, x, pos):
        B = x.shape[0]
        cls_tok = jnp.broadcast_to(self.cls, (B, 1, self.embed_dim))
        phenos_emb = phenos[..., None] * self.w_pheno                  # (B, P, E)
        freqs = (jnp.arange(self.embed_dim, dtype=jnp.float32) + 1.0) / self.embed_dim
        pos_emb = jnp.sin(pos[..., None].astype(jnp.float32) * freqs)  # (B, S, E)
        seq_out = x[..., None] * self.w_geno + 0.1 * pos_emb           # (B, S, E)
        return cls_tok, phenos_emb, seq_out


class TransformerModel:
    def __init__(self, key, encoder, params, force_pallas=False):
        self.encoder = encoder
        embed_dim = encoder.embed_dim
        output_type = params['output_type']
        num_phenos = params['num_phenos']
        seq_len = params['encoder_size']
        if output_type == 'tok':
            self.output = TokenOutput(key, embed_dim, force_pallas=force_pallas)
        elif output_type == 'binary':
            self.output = FlattenedOutput(key, embed_dim, seq_len, num_phenos,
                                          force_pallas=force_pallas)
        else:
            raise ValueError("output_type must be 'binary', or 'tok'")

    def __call__(self, phenos, x, pos):
        enc_out = self.encoder(phenos, x, pos)
        out = self.output(enc_out)
        self.last_output = out
        return out

    # TODO(synk): get_relevance_last_class relies on PyTorch autograd state of
    # encoder internals (block.A.grad) — no forward-kernel equivalent.


# ----------------------------------------------------------------------------
# References & checks
# ----------------------------------------------------------------------------
def _ref_binary(cls_tok, phenos_emb, seq_out, w, b):
    B = cls_tok.shape[0]
    flat = jnp.concatenate([cls_tok, phenos_emb, seq_out], axis=1).reshape(B, -1)
    logits = jnp.matmul(flat, w, precision=lax.Precision.HIGHEST) + b
    return jax.nn.softmax(logits, axis=1)


def _ref_tok(cls_tok, w, b):
    cls2 = cls_tok.reshape(cls_tok.shape[0], -1)
    logits = jnp.matmul(cls2, w, precision=lax.Precision.HIGHEST) + b
    g = 0.5 * logits * (1.0 + lax.erf(logits * _INV_SQRT2))
    return jax.nn.softmax(g, axis=1)


def _check(out, ref, atol):
    assert out.shape == ref.shape
    assert bool(jnp.all(jnp.isfinite(out)))
    assert bool(jnp.allclose(jnp.sum(out, axis=1), 1.0, atol=1e-5))
    err = float(jnp.max(jnp.abs(out - ref)))
    assert err <= atol, f"max abs err {err} > {atol}"


# ----------------------------------------------------------------------------
# Driver
# ----------------------------------------------------------------------------
if __name__ == "__main__":
    E, P, S = 32, 2, 8                 # embed_dim, num_phenos, seq tokens
    params = {"output_type": "binary",
              "num_phenos": P,
              "encoder_size": S + 1}   # encoder_size counts the cls token

    key = jax.random.PRNGKey(0)
    (k_enc, k_head_bin, k_head_tok,
     k_ph, k_x, k_pos, k_ph2, k_x2, k_pos2) = jax.random.split(key, 9)

    encoder = SyntheticEncoder(k_enc, E, P, S)

    # --- small batch (B=2): Pallas path forced on (small shapes) --------------
    B = 2
    phenos = jax.random.normal(k_ph, (B, P), jnp.float32)
    x = jax.random.uniform(k_x, (B, S), jnp.float32, 0.0, 2.0)
    pos = jax.random.randint(k_pos, (B, S), 0, 100)
    cls_tok, phenos_emb, seq_out = encoder(phenos, x, pos)

    model_bin = TransformerModel(k_head_bin, encoder, params, force_pallas=True)
    out_bin = jax.block_until_ready(model_bin(phenos, x, pos))
    _check(out_bin, _ref_binary(cls_tok, phenos_emb, seq_out,
                                model_bin.output.w, model_bin.output.b), atol=2e-3)

    params_tok = dict(params, output_type="tok")
    model_tok = TransformerModel(k_head_tok, encoder, params_tok, force_pallas=True)
    out_tok = jax.block_until_ready(model_tok(phenos, x, pos))
    _check(out_tok, _ref_tok(cls_tok, model_tok.output.w, model_tok.output.b),
           atol=2e-3)

    # --- small batch, auto dispatch: plain-jnp fallback (no Pallas launch) ----
    model_bin.output.force_pallas = False
    out_fb = jax.block_until_ready(model_bin(phenos, x, pos))
    _check(out_fb, _ref_binary(cls_tok, phenos_emb, seq_out,
                               model_bin.output.w, model_bin.output.b), atol=1e-5)

    # --- larger batch (B=1024): auto Pallas path, 2 "parallel" grid tiles -----
    B2 = 1024
    phenos2 = jax.random.normal(k_ph2, (B2, P), jnp.float32)
    x2 = jax.random.uniform(k_x2, (B2, S), jnp.float32, 0.0, 2.0)
    pos2 = jax.random.randint(k_pos2, (B2, S), 0, 100)
    cls2_tok, phenos2_emb, seq2_out = encoder(phenos2, x2, pos2)

    out_bin2 = jax.block_until_ready(model_bin(phenos2, x2, pos2))
    _check(out_bin2, _ref_binary(cls2_tok, phenos2_emb, seq2_out,
                                 model_bin.output.w, model_bin.output.b), atol=2e-3)

    out_tok2 = jax.block_until_ready(model_tok(phenos2, x2, pos2))
    _check(out_tok2, _ref_tok(cls2_tok, model_tok.output.w, model_tok.output.b),
           atol=2e-3)

    print("KERNEL_OK")
</pallas_src>

<mosaic_0001>
module attributes {stable_mosaic.version = 11 : i64} {
  func.func @_flat_head_kernel(%arg0: i32, %arg1: memref<2x96xf32, #tpu.memory_space<vmem>>, %arg2: memref<2x256xf32, #tpu.memory_space<vmem>>, %arg3: memref<1x96xf32, #tpu.memory_space<vmem>>, %arg4: memref<1x256xf32, #tpu.memory_space<vmem>>, %arg5: memref<1xf32, #tpu.memory_space<smem>>, %arg6: memref<2x2xf32, #tpu.memory_space<vmem>>) attributes {dimension_semantics = [#tpu.dimension_semantics<parallel>], iteration_bounds = array<i64: 1>, scalar_prefetch = 0 : i64, scratch_operands = 0 : i64, tpu.core_type = #tpu.core_type<tc>, window_params = [{transform_indices = @transform_0, window_bounds = array<i64: 2, 96>}, {transform_indices = @transform_1, window_bounds = array<i64: 2, 256>}, {pipeline_mode = #tpu.pipeline_mode<synchronous>, transform_indices = @transform_2, window_bounds = array<i64: 1, 96>}, {pipeline_mode = #tpu.pipeline_mode<synchronous>, transform_indices = @transform_3, window_bounds = array<i64: 1, 256>}, {transform_indices = @transform_4, window_bounds = array<i64: 1>}, {transform_indices = @transform_5, window_bounds = array<i64: 2, 2>}]} {
    %c0 = arith.constant 0 : index
    %c0_0 = arith.constant 0 : index
    %0 = vector.load %arg1[%c0, %c0_0] : memref<2x96xf32, #tpu.memory_space<vmem>>, vector<2x96xf32>
    %c0_1 = arith.constant 0 : index
    %c0_2 = arith.constant 0 : index
    %1 = vector.load %arg2[%c0_1, %c0_2] : memref<2x256xf32, #tpu.memory_space<vmem>>, vector<2x256xf32>
    %c0_3 = arith.constant 0 : index
    %c0_4 = arith.constant 0 : index
    %2 = vector.load %arg3[%c0_3, %c0_4] : memref<1x96xf32, #tpu.memory_space<vmem>>, vector<1x96xf32>
    %c0_5 = arith.constant 0 : index
    %c0_6 = arith.constant 0 : index
    %3 = vector.load %arg4[%c0_5, %c0_6] : memref<1x256xf32, #tpu.memory_space<vmem>>, vector<1x256xf32>
    %4 = vector.broadcast %2 : vector<1x96xf32> to vector<2x96xf32>
    %5 = arith.mulf %0, %4 : vector<2x96xf32>
    %cst = arith.constant dense<0.000000e+00> : vector<2xf32>
    %6 = vector.multi_reduction <add>, %5, %cst [1] : vector<2x96xf32> to vector<2xf32>
    %7 = vector.shape_cast %6 : vector<2xf32> to vector<2x1xf32>
    %8 = vector.broadcast %3 : vector<1x256xf32> to vector<2x256xf32>
    %9 = arith.mulf %1, %8 : vector<2x256xf32>
    %cst_7 = arith.constant dense<0.000000e+00> : vector<2xf32>
    %10 = vector.multi_reduction <add>, %9, %cst_7 [1] : vector<2x256xf32> to vector<2xf32>
    %11 = vector.shape_cast %10 : vector<2xf32> to vector<2x1xf32>
    %12 = arith.addf %7, %11 : vector<2x1xf32>
    %c0_8 = arith.constant 0 : index
    %13 = memref.load %arg5[%c0_8] : memref<1xf32, #tpu.memory_space<smem>>
    %14 = vector.broadcast %13 : f32 to vector<2x1xf32>
    %15 = arith.addf %12, %14 : vector<2x1xf32>
    %cst_9 = arith.constant -6.000000e+01 : f32
    %cst_10 = arith.constant 6.000000e+01 : f32
    %16 = vector.broadcast %cst_9 : f32 to vector<2x1xf32>
    %17 = arith.maximumf %16, %15 : vector<2x1xf32>
    %18 = vector.broadcast %cst_10 : f32 to vector<2x1xf32>
    %19 = arith.minimumf %18, %17 : vector<2x1xf32>
    %cst_11 = arith.constant 0.000000e+00 : f32
    %20 = vector.broadcast %cst_11 : f32 to vector<2x1xf32>
    %21 = arith.subf %20, %19 : vector<2x1xf32>
    %22 = math.exp %21 : vector<2x1xf32>
    %cst_12 = arith.constant 1.000000e+00 : f32
    %23 = vector.broadcast %cst_12 : f32 to vector<2x1xf32>
    %24 = arith.addf %23, %22 : vector<2x1xf32>
    %25 = tpu.reciprocal %24 {approx = true} : vector<2x1xf32> -> vector<2x1xf32>
    %26 = tpu.iota {dimensions = array<i32: 1>} : vector<2x2xi32>
    %c0_i32 = arith.constant 0 : i32
    %27 = vector.broadcast %c0_i32 : i32 to vector<2x2xi32>
    %28 = arith.cmpi eq, %26, %27 : vector<2x2xi32>
    %cst_13 = arith.constant 1.000000e+00 : f32
    %29 = vector.broadcast %cst_13 : f32 to vector<2x1xf32>
    %30 = arith.subf %29, %25 : vector<2x1xf32>
    %31 = vector.shape_cast %25 : vector<2x1xf32> to vector<2x1xf32>
    %32 = vector.broadcast %31 : vector<2x1xf32> to vector<2x2xf32>
    %33 = vector.shape_cast %30 : vector<2x1xf32> to vector<2x1xf32>
    %34 = vector.broadcast %33 : vector<2x1xf32> to vector<2x2xf32>
    %35 = arith.select %28, %32, %34 : vector<2x2xi1>, vector<2x2xf32>
    %c0_14 = arith.constant 0 : index
    %c0_15 = arith.constant 0 : index
    %36 = vector.load %arg6[%c0_14, %c0_15] : memref<2x2xf32, #tpu.memory_space<vmem>>, vector<2x2xf32>
    tpu.vector_store %arg6[%c0_14, %c0_15], %35 {strides = array<i32>} : memref<2x2xf32, #tpu.memory_space<vmem>>, vector<2x2xf32>,
    return
  }
  func.func @transform_0(%arg0: i32) -> (i32, i32) {
    %c0_i32 = arith.constant 0 : i32
    %c0_i32_0 = arith.constant 0 : i32
    return %arg0, %c0_i32 : i32, i32
  }
  func.func @transform_1(%arg0: i32) -> (i32, i32) {
    %c0_i32 = arith.constant 0 : i32
    %c0_i32_0 = arith.constant 0 : i32
    return %arg0, %c0_i32 : i32, i32
  }
  func.func @transform_2(%arg0: i32) -> (i32, i32) {
    %c0_i32 = arith.constant 0 : i32
    %c0_i32_0 = arith.constant 0 : i32
    %c0_i32_1 = arith.constant 0 : i32
    return %c0_i32, %c0_i32_0 : i32, i32
  }
  func.func @transform_3(%arg0: i32) -> (i32, i32) {
    %c0_i32 = arith.constant 0 : i32
    %c0_i32_0 = arith.constant 0 : i32
    %c0_i32_1 = arith.constant 0 : i32
    return %c0_i32, %c0_i32_0 : i32, i32
  }
  func.func @transform_4(%arg0: i32) -> i32 {
    %c0_i32 = arith.constant 0 : i32
    %c0_i32_0 = arith.constant 0 : i32
    return %c0_i32 : i32
  }
  func.func @transform_5(%arg0: i32) -> (i32, i32) {
    %c0_i32 = arith.constant 0 : i32
    %c0_i32_0 = arith.constant 0 : i32
    return %arg0, %c0_i32 : i32, i32
  }
}

</mosaic_0001>

<bundles_post_ra>
// kernel: tpu_custom_call.1
= control target key start
LH: loop header
LB: loop body
LE: loop exit
PB: predicated region body
PF: predicated region fallthrough
CT: control target
= control target key end

     0   :  { %vm33_vm0 = vcmask 779264   ;;  %v38_v2 = vlaneseq  ;;  %v137_v5 = vmov 1983009808   ;;  %s196_s0 = inlined_call_operand.vmem [shape: f32[2,96], index: 0, kind: input, shape index: {}]   ;;  %s197_s1 = inlined_call_operand.vmem [shape: f32[2,256], index: 1, kind: input, shape index: {}]   ;;  %s198_s2 = inlined_call_operand.vmem [shape: f32[1,96], index: 2, kind: input, shape index: {}]   ;;  %s199_s3 = inlined_call_operand.vmem [shape: f32[1,256], index: 3, kind: input, shape index: {}]   ;;  %s200_s4 = inlined_call_operand.<no memory space> [shape: f32[1], index: 4, kind: input, shape index: {}]   ;;  %s201_s5 = inlined_call_operand.hbm [shape: f32[2,2], index: 5, kind: output, shape index: {}]  }
   0x1   :  { %v22_v0 = vld [vmem:[%s196_s0] sm:$0x3]  ;;  %v48_v6 = vunpack.c.l.s4 %v137_v5 }
   0x2   :  { %v105_v1 = vld [vmem:[%s198_s2] ss:$0 sm:$0xff]  ;;  %v39_v4 = vshrl.u32 %v38_v2, 7 }
   0x3   :  { %v32_v3 = vmul.f32 %v105_v1, %v22_v0 }
   0x4   :  { %11 = vsyncpa [#allocation4], 0  ;;  %v25_v8 = vld [vmem:[%s199_s3] sm:$0x3]  ;;  %v40_v9 = vsub.s32 0, %v39_v4  ;;  %v44_v10 = vsub.s32 1, %v39_v4  ;;  %v49_v11 = vunpack.c.0.s8 %v48_v6  ;;  %v75_v25 = vstv %s200_s4 }
   0x5   :  { %v34_v7 = vsel %vm33_vm0, %v32_v3, 0.0  ;;  %v23_v16 = vld [vmem:[%s197_s1] sm:$0xf]  ;;  %vm67_vm1 = vcmask 1041408   ;;  %v85_v34 = vand.u32 127, %v38_v2  ;;  %s138_s1 = smov [#allocation3]  }
   0x6   :  { %35 = vadd.xlane.f32.xlu0 %v34_v7  ;;  %v41_v12 = vrot.slane %v25_v8, %v40_v9  ;;  %v45_v13 = vrot.slane %v25_v8, %v44_v10  ;;  %v52_v14 = vsub.s32 %v49_v11, %v39_v4  ;;  %s97_s25 = sshll.u32 %s138_s1, 4  ;;  %vm89_vm3 = vcmask 9216   ;;  %s98_s25 = int_to_ptr.vmem [resolvable:$true] %s97_s25 }
   0x7   :  { %vm86_vm2 = vcmp.eq.s32.totalorder %v85_v34, 0  ;;  %s113_s4 = scalar_lea.vmem %s98_s25, 32  ;;  %p118_p1 = scmp.lt.s32.totalorder %s98_s25, %s98_s25 }
   0x8   :  { %v46_v15 = vcombine.low %v41_v12, %v45_v13  ;;  %p114_p0 = scmp.ne.s32.totalorder %s98_s25, %s113_s4  ;;  %p119_p2 = scmp.lt.s32.totalorder %s113_s4, %s113_s4 }
   0xa   :  { %v53_v17 = vrot.slane %v46_v15, %v52_v14  ;;  %p120_p3 = por %p119_p2, %p118_p1 }
   0xc   :  { %v55_v18 = vmul.f32 %v53_v17, %v23_v16  ;;  %p121_p4 = pnand %p120_p3, %p114_p0 }
   0xe   :  { %v63_v19 = vrot.slane %v55_v18, %v52_v14 }
  0x10   :  { %v64_v20 = vcombine.high %v63_v19, %v63_v19  ;;  %v68_v21 = vsel %vm67_vm1, %v63_v19, 0.0 }
  0x12   :  { %v69_v22 = vsel %vm67_vm1, %v64_v20, 0.0 }
  0x13   :  { %v70_v23 = vadd.f32 %v69_v22, %v68_v21 }
  0x15   :  { %71 = vadd.xlane.f32.xlu0 %v70_v23 }
  0x93   :  { %v36_v24 = vpop.xlane.xlu0 %35 }
  0xa2   :  { %v72_v26 = vpop.xlane.xlu0 %71 }
  0xa3   :  { %v73_v27 = vadd.f32 %v72_v26, %v36_v24 }
  0xa5   :  { %v76_v28 = vadd.f32 %v75_v25, %v73_v27 }
  0xa7   :  { %v106_v29 = vclamps-f32 %v76_v28, 60.0 }
  0xa9   :  { %v79_v30 = vsub.f32 0.0, %v106_v29 }
  0xab   :  { %v80_v31 = vmul.f32 1.442695, %v79_v30 }
  0xad   :  { %109 = vpow2.f32 %v80_v31 }
  0xb7   :  { %v110_v32 = vpop.eup %109 }
  0xb8   :  { %v82_v33 = vadd.f32 1.0, %v110_v32 }
  0xba   :  { %111 = vrcp.f32 %v82_v33 }
  0xc4   :  { %v112_v35 = vpop.eup %111 }
  0xc5   :  { %v87_v36 = vsub.f32 1.0, %v112_v35 }
  0xc7   :  { %v88_v37 = vsel %vm86_vm2, %v112_v35, %v87_v36 }
  0xc8   :  { %90 = vst.msk [vmem:[#allocation3] sm:$0x3] %vm89_vm3, %v88_v37 }
  0xc9   :  { %124 = shalt.err (!%p121_p4)
}
  0xca   :  { %s125_s28 = scalar_lea.hbm %s201_s5, 32 }
  0xcb   :  { %p126_p5 = scmp.ne.s32.totalorder %s201_s5, %s125_s28  ;;  %p129_p6 = scmp.lt.u32.totalorder %s125_s28, %s201_s5 }
  0xcd   :  { %p131_p7 = pnand %p129_p6, %p126_p5 }
  0xcf   :  { %134 = shalt.err (!%p131_p7)
}
  0xd0   :  { %100 = dma.vmem_to_hbm [thread:$0]  %s98_s25, 32, %s201_s5, [#allocation4]  }
  0xd1   :  { %135 = dma.done.wait [#allocation4], 32  }
  0xd2   :  { %136 = vsyncadd [#allocation4], 4294967264 }
  0xd3   :  { %104 = vsyncpa [#allocation4], 1 }

</bundles_post_ra>
